<compile_context>
chip_gen: v5e
topology: v5e:2x2
jax: 0.10.0
libtpu: 0.0.40
codegen_flags: <defaults>
</compile_context>

<pallas_src>
import jax
import jax.numpy as jnp
from jax.experimental import pallas as pl
from jax.experimental.pallas import tpu as pltpu

_LANE = 128
_SUBLANE_BYTES = 32  # min sublane tile rows = 32 // itemsize (8 f32 / 16 bf16 / 32 i8)


def _round_up(x, m):
    return ((x + m - 1) // m) * m


def _round_down(x, m):
    return (x // m) * m


def spatial_attention_kernel(w_ref, b_ref, x_ref, o_ref):
    # w_ref: VMEM (C, 1) f32 weights (resident; constant index_map)
    # b_ref: SMEM (1, 1) f32 bias
    # x_ref: VMEM (TB, C, T_HW) input tile
    # o_ref: VMEM (TB, T_HW) output tile (lane-dense -> unmasked stores)
    x = x_ref[...].astype(jnp.float32)          # (TB, C, T_HW)
    w = w_ref[...].astype(jnp.float32)          # (C, 1)
    # Per-pixel channel reduction on the VPU; C is tiny so no MXU round-trip.
    y = jnp.sum(x * w[None, :, :], axis=1)      # (TB, T_HW), f32 accumulate
    o_ref[...] = (y + b_ref[0, 0]).astype(o_ref.dtype)


def _choose_tiles(B, C, HW, in_dtype, out_dtype,
                  max_hw_tile=32768,
                  target_step_bytes=4 << 20,     # ~4 MiB real HBM traffic / step
                  vmem_budget_bytes=20 << 20):   # double-buffered VMEM cap
    """Pick (tb, t_hw) so each grid step moves multi-MiB of real HBM traffic
    while the double-buffered VMEM footprint (including the C->sublane-min
    padding) stays inside the smallest scoped-VMEM default across v5e/v6e/v7x."""
    in_bytes = jnp.dtype(in_dtype).itemsize
    out_bytes = jnp.dtype(out_dtype).itemsize
    sub_in = max(8, _SUBLANE_BYTES // in_bytes)
    sub_out = max(8, _SUBLANE_BYTES // out_bytes)
    c_pad = _round_up(C, sub_in)                 # e.g. C=4 f32 pads to 8 sublanes

    def traffic(tb, t_hw):                       # real (unpadded) HBM bytes / step
        return tb * t_hw * (C * in_bytes + out_bytes)

    def vmem(tb, t_hw):                          # double-buffered VMEM estimate
        in_blk = tb * c_pad * t_hw * in_bytes
        out_blk = _round_up(tb, sub_out) * t_hw * out_bytes
        return 2 * (in_blk + out_blk)

    # Batch tile: full batch when small (== B satisfies the (8,128) rule on the
    # output block's sublane dim), otherwise multiples of 8 (grown below).
    tb = B if B <= 8 else 8

    # HW tile: full extent when it fits, else a large multiple-of-128 lane tile.
    if HW <= max_hw_tile and vmem(tb, HW) <= vmem_budget_bytes:
        t_hw = HW
    else:
        t_hw = max(_LANE, _round_down(min(HW, max_hw_tile), _LANE))
        while t_hw > _LANE and vmem(tb, t_hw) > vmem_budget_bytes:
            t_hw = max(_LANE, _round_down(t_hw // 2, _LANE))

    # Grow the batch tile (no hard tb=8 cap) so small-HW / large-B shapes still
    # amortize the ~0.35 us per-step overhead with multi-MiB DMAs.
    if B > 8:
        max_tb = _round_down(B, 8)
        while tb < max_tb and traffic(tb, t_hw) < target_step_bytes:
            new_tb = min(tb * 2, max_tb)
            if new_tb == tb or vmem(new_tb, t_hw) > vmem_budget_bytes:
                break
            tb = new_tb

    # v7x megacore: guarantee >= 2 grid steps along a "parallel" axis whenever
    # the shape can be split into lane-dense (>=128, multiple-of-128) tiles,
    # so both TensorCores (2x aggregate HBM bandwidth) get work.
    n_steps = -(-B // tb) * -(-HW // t_hw)
    if n_steps == 1:
        if HW >= 2 * _LANE:
            t_hw = _round_up(-(-HW // 2), _LANE)
        elif B >= 16:
            tb = max(8, _round_down(B // 2, 8))

    return tb, t_hw


def spatial_attention(x, weight, bias, *, max_hw_tile=32768):
    """x: (B, C, H, W) NCHW; weight: (1, C, 1, 1); bias: (1,). Returns (B, 1, H, W)."""
    B, C, H, W = x.shape
    HW = H * W

    x3 = x.reshape(B, C, HW)                         # no-copy view of NCHW
    w_col = weight.reshape(C, 1).astype(jnp.float32)
    b2 = bias.reshape(1, 1).astype(jnp.float32)

    out_dtype = x.dtype
    tb, t_hw = _choose_tiles(B, C, HW, x.dtype, out_dtype, max_hw_tile=max_hw_tile)

    grid = (pl.cdiv(B, tb), pl.cdiv(HW, t_hw))

    # 32 MiB scoped VMEM works on every generation (v5e/v6e: 128 MiB physical,
    # v7x: 64 MiB) and unblocks the large-tile config past v5e's 16 MiB scoped
    # default; tile selection keeps the double-buffered footprint <= ~20 MiB.
    vmem_limit_bytes = 32 * 1024 * 1024

    out = pl.pallas_call(
        spatial_attention_kernel,
        out_shape=jax.ShapeDtypeStruct((B, HW), out_dtype),
        grid=grid,
        in_specs=[
            pl.BlockSpec((C, 1), lambda i, j: (0, 0)),                           # weights (resident)
            pl.BlockSpec((1, 1), lambda i, j: (0, 0), memory_space=pltpu.SMEM),  # bias
            pl.BlockSpec((tb, C, t_hw), lambda i, j: (i, 0, j)),                 # x tile
        ],
        out_specs=pl.BlockSpec((tb, t_hw), lambda i, j: (i, j)),
        compiler_params=pltpu.CompilerParams(
            dimension_semantics=("parallel", "parallel"),
            vmem_limit_bytes=vmem_limit_bytes),
    )(w_col, b2, x3)

    return out.reshape(B, 1, H, W)


if __name__ == "__main__":
    key = jax.random.PRNGKey(0)
    kx, kw, kb = jax.random.split(key, 3)

    B, C, H, W = 2, 4, 16, 16          # dim = 4
    x = jax.random.normal(kx, (B, C, H, W), dtype=jnp.float32)

    # Conv2d(dim, 1, kernel_size=1, bias=True) parameter shapes.
    weight = jax.random.normal(kw, (1, C, 1, 1), dtype=jnp.float32) * 0.1
    bias = jax.random.normal(kb, (1,), dtype=jnp.float32) * 0.1

    y = spatial_attention(x, weight, bias)
    jax.block_until_ready(y)

    # Reference: pure elementwise 1x1-conv equivalent (f32, no MXU).
    y_ref = (x * weight.reshape(1, C, 1, 1)).sum(axis=1, keepdims=True) + bias[0]

    assert y.shape == (B, 1, H, W)
    assert jnp.allclose(y, y_ref, atol=1e-5, rtol=1e-5)

    print("KERNEL_OK")
</pallas_src>

<mosaic_0001>
module attributes {stable_mosaic.version = 11 : i64} {
  func.func @spatial_attention_kernel(%arg0: i32, %arg1: i32, %arg2: memref<4x1xf32, #tpu.memory_space<vmem>>, %arg3: memref<1x1xf32, #tpu.memory_space<smem>>, %arg4: memref<2x4x128xf32, #tpu.memory_space<vmem>>, %arg5: memref<2x128xf32, #tpu.memory_space<vmem>>) attributes {dimension_semantics = [#tpu.dimension_semantics<parallel>, #tpu.dimension_semantics<parallel>], iteration_bounds = array<i64: 1, 2>, scalar_prefetch = 0 : i64, scratch_operands = 0 : i64, tpu.core_type = #tpu.core_type<tc>, window_params = [{pipeline_mode = #tpu.pipeline_mode<synchronous>, transform_indices = @transform_0, window_bounds = array<i64: 4, 1>}, {transform_indices = @transform_1, window_bounds = array<i64: 1, 1>}, {transform_indices = @transform_2, window_bounds = array<i64: 2, 4, 128>}, {transform_indices = @transform_3, window_bounds = array<i64: 2, 128>}]} {
    %c0 = arith.constant 0 : index
    %c0_0 = arith.constant 0 : index
    %c0_1 = arith.constant 0 : index
    %0 = vector.load %arg4[%c0, %c0_0, %c0_1] : memref<2x4x128xf32, #tpu.memory_space<vmem>>, vector<2x4x128xf32>
    %c0_2 = arith.constant 0 : index
    %c0_3 = arith.constant 0 : index
    %1 = vector.load %arg2[%c0_2, %c0_3] : memref<4x1xf32, #tpu.memory_space<vmem>>, vector<4x1xf32>
    %2 = vector.shape_cast %1 : vector<4x1xf32> to vector<1x4x1xf32>
    %3 = vector.broadcast %2 : vector<1x4x1xf32> to vector<2x4x128xf32>
    %4 = arith.mulf %0, %3 : vector<2x4x128xf32>
    %cst = arith.constant dense<0.000000e+00> : vector<2x128xf32>
    %5 = vector.multi_reduction <add>, %4, %cst [1] : vector<2x4x128xf32> to vector<2x128xf32>
    %c0_4 = arith.constant 0 : index
    %c0_5 = arith.constant 0 : index
    %6 = memref.load %arg3[%c0_4, %c0_5] : memref<1x1xf32, #tpu.memory_space<smem>>
    %7 = vector.broadcast %6 : f32 to vector<2x128xf32>
    %8 = arith.addf %5, %7 : vector<2x128xf32>
    %c0_6 = arith.constant 0 : index
    %c0_7 = arith.constant 0 : index
    %9 = vector.load %arg5[%c0_6, %c0_7] : memref<2x128xf32, #tpu.memory_space<vmem>>, vector<2x128xf32>
    tpu.vector_store %arg5[%c0_6, %c0_7], %8 {strides = array<i32>} : memref<2x128xf32, #tpu.memory_space<vmem>>, vector<2x128xf32>,
    return
  }
  func.func @transform_0(%arg0: i32, %arg1: i32) -> (i32, i32) {
    %c0_i32 = arith.constant 0 : i32
    %c0_i32_0 = arith.constant 0 : i32
    %c0_i32_1 = arith.constant 0 : i32
    return %c0_i32, %c0_i32_0 : i32, i32
  }
  func.func @transform_1(%arg0: i32, %arg1: i32) -> (i32, i32) {
    %c0_i32 = arith.constant 0 : i32
    %c0_i32_0 = arith.constant 0 : i32
    %c0_i32_1 = arith.constant 0 : i32
    return %c0_i32, %c0_i32_0 : i32, i32
  }
  func.func @transform_2(%arg0: i32, %arg1: i32) -> (i32, i32, i32) {
    %c0_i32 = arith.constant 0 : i32
    %c0_i32_0 = arith.constant 0 : i32
    return %arg0, %c0_i32, %arg1 : i32, i32, i32
  }
  func.func @transform_3(%arg0: i32, %arg1: i32) -> (i32, i32) {
    %c0_i32 = arith.constant 0 : i32
    return %arg0, %arg1 : i32, i32
  }
}

</mosaic_0001>

<bundles_post_ra>
// kernel: tpu_custom_call.1
= control target key start
LH: loop header
LB: loop body
LE: loop exit
PB: predicated region body
PF: predicated region fallthrough
CT: control target
= control target key end

     0   :  { %s691_s0 = inlined_call_operand.vmem [shape: f32[4,1], index: 0, kind: input, shape index: {}]   ;;  %s692_s1 = inlined_call_operand.<no memory space> [shape: f32[1,1], index: 1, kind: input, shape index: {}]   ;;  %s693_s2 = inlined_call_operand.hbm [shape: f32[2,4,256], index: 2, kind: input, shape index: {}]   ;;  %s694_s3 = inlined_call_operand.hbm [shape: f32[2,256], index: 3, kind: output, shape index: {}]  }
   0x1   :  { %8 = sst [smem:[#allocation2]] %s692_s1 }
   0x2   :  { %9 = vsyncpa [#allocation4], 0 }
   0x3   :  { %11 = vsyncpa [#allocation4 + $0x1], 0 }
   0x4   :  { %12 = vsyncpa [#allocation5], 0 }
   0x5   :  { %14 = vsyncpa [#allocation5 + $0x1], 0  ;;  %s567_s14 = smov 0   ;;  %s569_s15 = smov 0  }
   0x6   :  { %s571_s16 = smov 0   ;;  %s573_s17 = smov 0  }
   0x7   :  { %s575_s18 = smov 0   ;;  %s577_s19 = smov 0  }
   0x8 LB: > { %s346_s1 = sadd.s32 4294967295, %s538_s19   ;;  %s347_s20 = sadd.s32 4294967294, %s538_s19   ;;  %s538_s19 = sphi %s577_s19, %s20_s19   ;;  %s534_s18 = sphi %s575_s18, %s703_s18   ;;  %s530_s17 = sphi %s573_s17, %s702_s17   ;;  %s526_s16 = sphi %s571_s16, %s701_s16   ;;  %s522_s15 = sphi %s569_s15, %s700_s15   ;;  %s518_s14 = sphi %s567_s14, %s699_s14  }
   0x9   : > { %s29_s21 = sadd.s32 1, %s534_s18  ;;  %s83_s22 = sadd.s32 1, %s526_s16 }
   0xa   : > { %p30_p0 = scmp.ge.s32.totalorder %s29_s21, 2  ;;  %p90_p1 = scmp.ne.s32.totalorder %s526_s16, %s522_s15 }
   0xb   : > { %p91_p2 = scmp.eq.s32.totalorder %s538_s19, 0  ;;  %p96_p3 = scmp.ne.s32.totalorder %s522_s15, %s518_s14 }
   0xc   : > { %s705_s21 = smov (%p30_p0, %s29_s21), 0  ;;  %p97_p5 = scmp.eq.s32.totalorder %s346_s1, 0 }
   0xd   : > { %p608_p4 = por %p91_p2, %p90_p1  ;;  %s79_s24 = ssub.s32 %s534_s18, %s705_s21 }
   0xe   : > { %p122_p6 = scmp.eq.s32.totalorder %s346_s1, 1  ;;  %p81_p7 = scmp.eq.s32.totalorder %s79_s24, 0 }
   0xf   : > { %p614_p8 = por %p97_p5, %p96_p3  ;;  %p128_p10 = scmp.eq.s32.totalorder %s347_s20, 1 }
  0x10   : > { %p618_p9 = por %p122_p6, %p90_p1  ;;  %p349_p12 = scmp.ge.s32.totalorder %s538_s19, 2 }
  0x11   : > { %s623_s27 = scalar_select %p81_p7, %s526_s16, %s83_s22  }
  0x12   : > { %p625_p11 = por %p128_p10, %p96_p3  ;;  %p371_p13 = scmp.lt.s32.totalorder %s538_s19, 2 }
  0x13   : > { %s154_s29 = sand.u32 1, %s526_s16   ;;  %s351_s4 = sshll.u32 %s534_s18, 2 }
  0x14   : > { %s350_s30 = sshll.u32 %s154_s29, 3  ;;  %s165_s7 = scalar_lea.hbm %s693_s2, %s351_s4 }
  0x15   : > { %s158_s8 = scalar_lea.vmem [#allocation3], %s350_s30  ;;  %s166_s10 = sshll.u32 %s165_s7, 4  ;;  %s167_s10 = int_to_ptr.hbm [resolvable:$true] %s166_s10 }
  0x16   : > { %s168_s9 = sshll.u32 %s158_s8, 4  ;;  %p364_p0 = pnand %p371_p13, %p608_p4  ;;  %s169_s9 = int_to_ptr.vmem [resolvable:$true] %s168_s9 }
  0x17   : > { %s155_s11 = scalar_lea.sflag [#allocation4], %s154_s29  ;;  %s540_s12 = smov 128  }
  0x18   : > { %s541_s13 = smov 64   ;;  %s542_s1 = smov 4  }
  0x19   : > { %366 = dma.hbm_to_vmem [thread:$0]  (!%p364_p0), %s167_s10, 128, %s169_s9, %s155_s11, %s540_s12, %s541_s13, %s542_s1  }
  0x1a   : > { %p352_p1 = scmp.ge.s32.totalorder %s538_s19, 1  ;;  %p176_p2 = scmp.lt.s32.totalorder %s538_s19, 3 }
  0x1c   : > { %p177_p3 = pnand %p352_p1, %p176_p2 }
  0x1d   : > { %s641_s20 = sand.u32 (!%p177_p3), 1, %s522_s15  }
  0x1e   : > { %180 = sbr.rel (%p177_p3) target bundleno = 174 (0xae), region = 32  ;;  %s353_s22 = sshll.u32 (!%p177_p3), %s641_s20, 3 }
  0x1f   : > { %s183_s24 = scalar_lea.sflag (!%p177_p3), [#allocation4], %s641_s20  ;;  %s186_s30 = scalar_lea.vmem (!%p177_p3), [#allocation3], %s353_s22 }
  0x23   : > { %509 = dma.done.wait (%p614_p8), %s183_s24, 128  }
  0x24   : > { %511 = vsyncadd (%p614_p8), %s183_s24, 4294967168  ;;  %v543_v0 = vmov 0   ;;  %v213_v1 = vld [vmem:[%s691_s0] sm:$0xf]  ;;  %v212_v3 = vld [vmem:[%s186_s30 + $0x4] sm:$0xf] }
  0x25   : > { %425 = vset.pattern.permute.xlu0 %v543_v0  ;;  %v211_v2 = vld [vmem:[%s186_s30] sm:$0xf]  ;;  %vm221_vm0 = vcmask 1043456   ;;  %s236_s25 = sld [smem:[#allocation2]]  ;;  %s354_s4 = sshll.u32 %s641_s20, 1  ;;  %vm242_vm1 = vcmask 1041409  }
  0x26   : > { %216 = vperm.xlu0 %425, %v213_v1   ;;  %s356_s5 = sshll.u32 %s530_s17, 1  ;;  %s209_s9 = scalar_lea.vmem [#allocation6], %s354_s4 }
  0x27   : > { %s259_s8 = scalar_lea.hbm %s694_s3, %s356_s5  ;;  %s261_s10 = sshll.u32 %s209_s9, 4  ;;  %s262_s10 = int_to_ptr.vmem [resolvable:$true] %s261_s10 }
  0x28   : > { %s263_s11 = sshll.u32 %s259_s8, 4  ;;  %s247_s17 = scalar_lea.sflag [#allocation5], %s641_s20  ;;  %s264_s11 = int_to_ptr.hbm [resolvable:$true] %s263_s11 }
  0x29   : > { %s470_s12 = sshra.s32 %s264_s11, 4  ;;  %s476_s24 = scalar_lea.hbm %s694_s3, 4  ;;  %s471_s12 = int_to_ptr.hbm [resolvable:$true] %s470_s12 }
  0x2a   : > { %s472_s13 = scalar_lea.hbm %s471_s12, 2  ;;  %p477_p7 = scmp.lt.s32.totalorder %s471_s12, %s694_s3 }
  0x2b   : > { %v237_v19 = vstv %s236_s25  ;;  %p473_p4 = scmp.ne.s32.totalorder %s471_s12, %s472_s13  ;;  %p478_p8 = scmp.lt.s32.totalorder %s476_s24, %s472_s13 }
  0x2d   : > { %p474_p5 = pnand %p473_p4, %p618_p9  ;;  %p479_p10 = por %p478_p8, %p477_p7 }
  0x2f   : > { %p475_p6 = pneg %p474_p5 }
  0x31   : > { %p480_p13 = pnand %p479_p10, %p475_p6 }
  0x98   : > { %v217_v4 = vpop.permute.xlu0 %216 }
  0x99   : > { %v219_v5 = vmul.f32 %v217_v4, %v211_v2  ;;  %v220_v6 = vmul.f32 %v217_v4, %v212_v3 }
  0x9b   : > { %v222_v7 = vsel %vm221_vm0, %v219_v5, 0.0  ;;  %v229_v8 = vsel %vm221_vm0, %v220_v6, 0.0 }
  0x9c   : > { %v223_v9 = vrot.slane %v222_v7, 4  ;;  %v230_v10 = vrot.slane %v229_v8, 4 }
  0x9e   : > { %v224_v11 = vadd.f32 %v223_v9, %v222_v7  ;;  %v231_v12 = vadd.f32 %v230_v10, %v229_v8 }
  0xa0   : > { %v225_v13 = vrot.slane %v224_v11, 2  ;;  %v232_v14 = vrot.slane %v231_v12, 2 }
  0xa2   : > { %v226_v15 = vadd.f32 %v225_v13, %v224_v11  ;;  %v233_v16 = vadd.f32 %v232_v14, %v231_v12 }
  0xa4   : > { %v227_v17 = vrot.slane %v226_v15, 1  ;;  %v234_v18 = vrot.slane %v233_v16, 1 }
  0xa6   : > { %v228_v20 = vadd.f32 %v227_v17, %v226_v15  ;;  %v235_v21 = vadd.f32 %v234_v18, %v233_v16 }
  0xa8   : > { %v238_v22 = vadd.f32 %v237_v19, %v228_v20  ;;  %v239_v23 = vadd.f32 %v237_v19, %v235_v21 }
  0xaa   : > { %v243_v24 = vsel %vm242_vm1, %v239_v23, %v238_v22 }
  0xab   : > { %245 = vst [vmem:[%s209_s9] sm:$0x3] %v243_v24 }
  0xac   : > { %483 = shalt.err (!%p480_p13)
}
  0xad   : > { %361 = dma.vmem_to_hbm [thread:$0]  (%p618_p9), %s262_s10, 32, %s264_s11, %s247_s17  }
  0xae PF: > { %s275_s20 = sand.u32 1, %s518_s14   ;;  %p368_p0 = pnand %p349_p12, %p625_p11 }
  0xaf   : > { %s276_s29 = scalar_lea.sflag [#allocation5], %s275_s20 }
  0xb0   : > { %p369_p1 = pneg %p368_p0 }
  0xb2   : > { %513 = dma.done.wait (%p369_p1), %s276_s29, 32  }
  0xb3   : > { %515 = vsyncadd (%p369_p1), %s276_s29, 4294967264  ;;  %s20_s19 = sadd.s32 1, %s538_s19   ;;  %s699_s14 = smov %s522_s15 }
  0xb4   : > { %p17_p2 = scmp.ge.s32.totalorder %s20_s19, 4   ;;  %s700_s15 = smov %s526_s16 }
  0xb5   : > { %s701_s16 = smov %s623_s27  ;;  %s702_s17 = smov %s534_s18 }
  0xb6   : > { %s703_s18 = smov %s705_s21  ;;  %19 = sbr.rel (!%p17_p2) target bundleno = 8 (0x8), region = 77 }
  0xbb   :  { %282 = vsyncpa [#allocation4], 1 }
  0xbc   :  { %284 = vsyncpa [#allocation4 + $0x1], 1 }
  0xbd   :  { %285 = vsyncpa [#allocation5], 1 }
  0xbe   :  { %287 = vsyncpa [#allocation5 + $0x1], 1 }

</bundles_post_ra>
